<compile_context>
chip_gen: v5e
topology: v5e:2x2
jax: 0.10.0
libtpu: 0.0.40
codegen_flags: <defaults>
</compile_context>

<pallas_src>
import jax
import jax.numpy as jnp
from jax.experimental import pallas as pl
from jax.experimental.pallas import tpu as pltpu

INPUT_SIZE = 28 * 28   # 784
HIDDEN1 = 128
HIDDEN2 = 64
OUTPUT = 10
PADDED_OUT = 128       # class dim padded to a full 128-lane register
NEG_BIG = -1e30        # finite "-inf" for padded class lanes (avoids NaN/inf downstream)


def mlp_kernel(x_ref, w1_ref, w2_ref, w3_ref, mask_ref, o_ref):
    # Cast the streamed x tile to the compute dtype in-kernel (x is read from
    # HBM once, in its incoming dtype; no wrapper astype/pad passes).
    x = x_ref[...].astype(w1_ref.dtype)

    # Layer 1: (tb, 784) @ (784, 128) -> f32 MXU accumulate, ReLU in f32.
    h1 = jnp.dot(x, w1_ref[...], preferred_element_type=jnp.float32)
    h1 = jnp.maximum(h1, 0.0).astype(w2_ref.dtype)
    # Layer 2: (tb, 128) @ (128, 64) -> ReLU
    h2 = jnp.dot(h1, w2_ref[...], preferred_element_type=jnp.float32)
    h2 = jnp.maximum(h2, 0.0).astype(w3_ref.dtype)
    # Output layer: (tb, 64) @ (64, 128)  (class dim zero-padded 10 -> 128)
    logits = jnp.dot(h2, w3_ref[...], preferred_element_type=jnp.float32)

    # Numerically stable log_softmax over the 10 real classes.  The padded
    # lanes get a precomputed additive -1e30 (resident (1,128) mask) instead
    # of a per-tile iota/compare/select, so they contribute 0 to the sum and
    # stay finite in the padded output buffer.
    masked = logits + mask_ref[...]
    m = jnp.max(masked, axis=-1, keepdims=True)
    shifted = masked - m
    lse = jnp.log(jnp.sum(jnp.exp(shifted), axis=-1, keepdims=True))
    o_ref[...] = (shifted - lse).astype(o_ref.dtype)


def prepare_params(w1, w2, w3, *, use_bf16=True):
    """Hoisted, once-per-model weight preprocessing (cast + class-dim pad + mask)."""
    dt = jnp.bfloat16 if use_bf16 else jnp.float32
    w1_c = w1.astype(dt)
    w2_c = w2.astype(dt)
    w3_c = jnp.pad(w3.astype(jnp.float32),
                   ((0, 0), (0, PADDED_OUT - OUTPUT))).astype(dt)
    mask = jnp.where(jnp.arange(PADDED_OUT) < OUTPUT, 0.0, NEG_BIG)
    mask = mask.astype(jnp.float32).reshape(1, PADDED_OUT)
    return w1_c, w2_c, w3_c, mask


def net_forward(x, params, *, block_b=1024, out_dtype=jnp.float32, slice_output=True):
    """Forward pass. x: (B, 784) in its natural dtype; params from prepare_params()."""
    w1_c, w2_c, w3_c, mask = params
    B = x.shape[0]
    assert x.shape[1] == INPUT_SIZE

    # Adaptive batch tile: minimize tail padding and keep >= 2-4 tiles for
    # large B (megacore load balance on v7x).  bf16 rows pack 2/sublane ->
    # align to 16; f32 aligns to 8.
    row_align = 16 if w1_c.dtype == jnp.bfloat16 else 8
    n_tiles = pl.cdiv(B, block_b)
    n_tiles = max(n_tiles, min(4, pl.cdiv(B, 128)))
    tb = pl.cdiv(B, n_tiles)
    tb = ((tb + row_align - 1) // row_align) * row_align
    grid = (pl.cdiv(B, tb),)
    b_pad = grid[0] * tb   # output rows padded so every output store is a full block

    out = pl.pallas_call(
        mlp_kernel,
        out_shape=jax.ShapeDtypeStruct((b_pad, PADDED_OUT), out_dtype),
        grid_spec=pltpu.PrefetchScalarGridSpec(
            num_scalar_prefetch=0,
            grid=grid,
            in_specs=[
                # x tile marches down the batch (double-buffered stream);
                # the last block may overhang B -> ragged read, masked writes.
                pl.BlockSpec((tb, INPUT_SIZE), lambda i: (i, 0)),
                # Weights and class mask: constant index_map -> VMEM-resident.
                pl.BlockSpec((INPUT_SIZE, HIDDEN1), lambda i: (0, 0)),
                pl.BlockSpec((HIDDEN1, HIDDEN2), lambda i: (0, 0)),
                pl.BlockSpec((HIDDEN2, PADDED_OUT), lambda i: (0, 0)),
                pl.BlockSpec((1, PADDED_OUT), lambda i: (0, 0)),
            ],
            out_specs=pl.BlockSpec((tb, PADDED_OUT), lambda i: (i, 0)),
        ),
        compiler_params=pltpu.CompilerParams(
            dimension_semantics=("parallel",),        # batch tiles across TCs (v7x)
            vmem_limit_bytes=32 * 1024 * 1024,        # covers large f32 tiles on v5e
        ),
    )(x, w1_c, w2_c, w3_c, mask)

    if slice_output:
        # Kept only to match the PyTorch (B, 10) interface; fuse into the
        # consumer (or pass slice_output=False) to avoid the extra HBM pass.
        return out[:B, :OUTPUT]
    return out


def net_forward_ref(x, w1, w2, w3, *, use_bf16=True):
    """Pure-JAX reference using the same compute dtypes as the kernel."""
    dt = jnp.bfloat16 if use_bf16 else jnp.float32
    h1 = jnp.maximum(
        jnp.dot(x.astype(dt), w1.astype(dt), preferred_element_type=jnp.float32), 0.0)
    h2 = jnp.maximum(
        jnp.dot(h1.astype(dt), w2.astype(dt), preferred_element_type=jnp.float32), 0.0)
    logits = jnp.dot(h2.astype(dt), w3.astype(dt), preferred_element_type=jnp.float32)
    return jax.nn.log_softmax(logits, axis=-1)


if __name__ == "__main__":
    key = jax.random.PRNGKey(0)
    kx, k1, k2, k3 = jax.random.split(key, 4)

    # Parameter shapes mirror the PyTorch module; fan-in scaling keeps the
    # activation magnitudes O(1) so the numeric comparison is meaningful.
    w1 = jax.random.normal(k1, (INPUT_SIZE, HIDDEN1), jnp.float32) / jnp.sqrt(INPUT_SIZE)
    w2 = jax.random.normal(k2, (HIDDEN1, HIDDEN2), jnp.float32) / jnp.sqrt(HIDDEN1)
    w3 = jax.random.normal(k3, (HIDDEN2, OUTPUT), jnp.float32) / jnp.sqrt(HIDDEN2)

    # --- Small batch, pure f32 path: exact semantics check vs f32 reference.
    params_f32 = prepare_params(w1, w2, w3, use_bf16=False)
    B_small = 8
    x_small = jax.random.normal(kx, (B_small, INPUT_SIZE), dtype=jnp.float32)
    out_f32 = jax.block_until_ready(net_forward(x_small, params_f32))
    ref_f32 = net_forward_ref(x_small, w1, w2, w3, use_bf16=False)
    assert out_f32.shape == (B_small, OUTPUT)
    assert jnp.allclose(out_f32, ref_f32, atol=1e-3, rtol=1e-3), "f32 path mismatch"

    # --- Ragged, multi-tile batch on the bf16 fast path: exercises the
    #     adaptive tiling, the ragged last block (no wrapper pad) and the
    #     lane-dense padded output store + in-kernel x cast.
    params_bf16 = prepare_params(w1, w2, w3, use_bf16=True)
    B_big = 72
    x_big = jax.random.normal(kx, (B_big, INPUT_SIZE), dtype=jnp.float32)
    out_bf16 = jax.block_until_ready(net_forward(x_big, params_bf16, block_b=32))
    ref_bf16 = net_forward_ref(x_big, w1, w2, w3, use_bf16=True)
    assert out_bf16.shape == (B_big, OUTPUT)
    assert jnp.all(jnp.isfinite(out_bf16)), "non-finite values in bf16 path"
    assert jnp.allclose(out_bf16, ref_bf16, atol=5e-2, rtol=5e-2), "bf16 path mismatch"

    print("KERNEL_OK")
</pallas_src>

<mosaic_0001>
module attributes {stable_mosaic.version = 11 : i64} {
  func.func @mlp_kernel(%arg0: i32, %arg1: memref<8x784xf32, #tpu.memory_space<vmem>>, %arg2: memref<784x128xf32, #tpu.memory_space<vmem>>, %arg3: memref<128x64xf32, #tpu.memory_space<vmem>>, %arg4: memref<64x128xf32, #tpu.memory_space<vmem>>, %arg5: memref<1x128xf32, #tpu.memory_space<vmem>>, %arg6: memref<8x128xf32, #tpu.memory_space<vmem>>) attributes {dimension_semantics = [#tpu.dimension_semantics<parallel>], iteration_bounds = array<i64: 1>, scalar_prefetch = 0 : i64, scratch_operands = 0 : i64, tpu.core_type = #tpu.core_type<tc>, window_params = [{transform_indices = @transform_0, window_bounds = array<i64: 8, 784>}, {pipeline_mode = #tpu.pipeline_mode<synchronous>, transform_indices = @transform_1, window_bounds = array<i64: 784, 128>}, {pipeline_mode = #tpu.pipeline_mode<synchronous>, transform_indices = @transform_2, window_bounds = array<i64: 128, 64>}, {pipeline_mode = #tpu.pipeline_mode<synchronous>, transform_indices = @transform_3, window_bounds = array<i64: 64, 128>}, {pipeline_mode = #tpu.pipeline_mode<synchronous>, transform_indices = @transform_4, window_bounds = array<i64: 1, 128>}, {transform_indices = @transform_5, window_bounds = array<i64: 8, 128>}]} {
    %c0 = arith.constant 0 : index
    %c0_0 = arith.constant 0 : index
    %0 = vector.load %arg1[%c0, %c0_0] : memref<8x784xf32, #tpu.memory_space<vmem>>, vector<8x784xf32>
    %c0_1 = arith.constant 0 : index
    %c0_2 = arith.constant 0 : index
    %1 = vector.load %arg2[%c0_1, %c0_2] : memref<784x128xf32, #tpu.memory_space<vmem>>, vector<784x128xf32>
    %cst = arith.constant dense<0.000000e+00> : vector<8x128xf32>
    %2 = tpu.matmul %0, %1, %cst {dimension_numbers = #tpu.dot_dimension_numbers<[1], [0], [0], [1], [0, 0, 1, 1], [], []>} : vector<8x784xf32>, vector<784x128xf32>, vector<8x128xf32> -> vector<8x128xf32>
    %cst_3 = arith.constant 0.000000e+00 : f32
    %3 = vector.broadcast %cst_3 : f32 to vector<8x128xf32>
    %4 = arith.maximumf %2, %3 : vector<8x128xf32>
    %c0_4 = arith.constant 0 : index
    %c0_5 = arith.constant 0 : index
    %5 = vector.load %arg3[%c0_4, %c0_5] : memref<128x64xf32, #tpu.memory_space<vmem>>, vector<128x64xf32>
    %cst_6 = arith.constant dense<0.000000e+00> : vector<8x64xf32>
    %6 = tpu.matmul %4, %5, %cst_6 {dimension_numbers = #tpu.dot_dimension_numbers<[1], [0], [0], [1], [0, 0, 1, 1], [], []>} : vector<8x128xf32>, vector<128x64xf32>, vector<8x64xf32> -> vector<8x64xf32>
    %cst_7 = arith.constant 0.000000e+00 : f32
    %7 = vector.broadcast %cst_7 : f32 to vector<8x64xf32>
    %8 = arith.maximumf %6, %7 : vector<8x64xf32>
    %c0_8 = arith.constant 0 : index
    %c0_9 = arith.constant 0 : index
    %9 = vector.load %arg4[%c0_8, %c0_9] : memref<64x128xf32, #tpu.memory_space<vmem>>, vector<64x128xf32>
    %cst_10 = arith.constant dense<0.000000e+00> : vector<8x128xf32>
    %10 = tpu.matmul %8, %9, %cst_10 {dimension_numbers = #tpu.dot_dimension_numbers<[1], [0], [0], [1], [0, 0, 1, 1], [], []>} : vector<8x64xf32>, vector<64x128xf32>, vector<8x128xf32> -> vector<8x128xf32>
    %c0_11 = arith.constant 0 : index
    %c0_12 = arith.constant 0 : index
    %11 = vector.load %arg5[%c0_11, %c0_12] : memref<1x128xf32, #tpu.memory_space<vmem>>, vector<1x128xf32>
    %12 = vector.broadcast %11 : vector<1x128xf32> to vector<8x128xf32>
    %13 = arith.addf %10, %12 : vector<8x128xf32>
    %cst_13 = arith.constant dense<0xFF800000> : vector<8xf32>
    %14 = vector.multi_reduction <maximumf>, %13, %cst_13 [1] : vector<8x128xf32> to vector<8xf32>
    %15 = vector.shape_cast %14 : vector<8xf32> to vector<8x1xf32>
    %16 = vector.broadcast %15 : vector<8x1xf32> to vector<8x128xf32>
    %17 = arith.subf %13, %16 : vector<8x128xf32>
    %18 = math.exp %17 : vector<8x128xf32>
    %cst_14 = arith.constant dense<0.000000e+00> : vector<8xf32>
    %19 = vector.multi_reduction <add>, %18, %cst_14 [1] : vector<8x128xf32> to vector<8xf32>
    %20 = vector.shape_cast %19 : vector<8xf32> to vector<8x1xf32>
    %21 = math.log %20 : vector<8x1xf32>
    %22 = vector.broadcast %21 : vector<8x1xf32> to vector<8x128xf32>
    %23 = arith.subf %17, %22 : vector<8x128xf32>
    %c0_15 = arith.constant 0 : index
    %c0_16 = arith.constant 0 : index
    %24 = vector.load %arg6[%c0_15, %c0_16] : memref<8x128xf32, #tpu.memory_space<vmem>>, vector<8x128xf32>
    tpu.vector_store %arg6[%c0_15, %c0_16], %23 {strides = array<i32>} : memref<8x128xf32, #tpu.memory_space<vmem>>, vector<8x128xf32>,
    return
  }
  func.func @transform_0(%arg0: i32) -> (i32, i32) {
    %c0_i32 = arith.constant 0 : i32
    %c0_i32_0 = arith.constant 0 : i32
    return %arg0, %c0_i32 : i32, i32
  }
  func.func @transform_1(%arg0: i32) -> (i32, i32) {
    %c0_i32 = arith.constant 0 : i32
    %c0_i32_0 = arith.constant 0 : i32
    %c0_i32_1 = arith.constant 0 : i32
    return %c0_i32, %c0_i32_0 : i32, i32
  }
  func.func @transform_2(%arg0: i32) -> (i32, i32) {
    %c0_i32 = arith.constant 0 : i32
    %c0_i32_0 = arith.constant 0 : i32
    %c0_i32_1 = arith.constant 0 : i32
    return %c0_i32, %c0_i32_0 : i32, i32
  }
  func.func @transform_3(%arg0: i32) -> (i32, i32) {
    %c0_i32 = arith.constant 0 : i32
    %c0_i32_0 = arith.constant 0 : i32
    %c0_i32_1 = arith.constant 0 : i32
    return %c0_i32, %c0_i32_0 : i32, i32
  }
  func.func @transform_4(%arg0: i32) -> (i32, i32) {
    %c0_i32 = arith.constant 0 : i32
    %c0_i32_0 = arith.constant 0 : i32
    %c0_i32_1 = arith.constant 0 : i32
    return %c0_i32, %c0_i32_0 : i32, i32
  }
  func.func @transform_5(%arg0: i32) -> (i32, i32) {
    %c0_i32 = arith.constant 0 : i32
    %c0_i32_0 = arith.constant 0 : i32
    return %arg0, %c0_i32 : i32, i32
  }
}

</mosaic_0001>

<bundles_post_ra>
// kernel: tpu_custom_call.1
= control target key start
LH: loop header
LB: loop body
LE: loop exit
PB: predicated region body
PF: predicated region fallthrough
CT: control target
= control target key end

     0   :  { %10 = vsyncpa [#allocation3], 0  ;;  %s587_s0 = inlined_call_operand.vmem [shape: f32[8,784], index: 0, kind: input, shape index: {}]   ;;  %s588_s1 = inlined_call_operand.hbm [shape: f32[784,128], index: 1, kind: input, shape index: {}]   ;;  %s589_s2 = inlined_call_operand.vmem [shape: f32[128,64], index: 2, kind: input, shape index: {}]   ;;  %s590_s3 = inlined_call_operand.vmem [shape: f32[64,128], index: 3, kind: input, shape index: {}]   ;;  %s591_s4 = inlined_call_operand.vmem [shape: f32[1,128], index: 4, kind: input, shape index: {}]   ;;  %s592_s5 = inlined_call_operand.hbm [shape: f32[8,128], index: 5, kind: output, shape index: {}]  }
   0x1   :  { %11 = vsyncpa [#allocation4], 0  ;;  %s18_s20 = sshll.u32 %s588_s1, 4  ;;  %s451_s21 = smov [#allocation2]   ;;  %s19_s20 = int_to_ptr.hbm [resolvable:$true] %s18_s20 }
   0x2   :  { %s20_s22 = sshll.u32 %s451_s21, 4  ;;  %s452_s23 = smov 128   ;;  %s21_s22 = int_to_ptr.vmem [resolvable:$true] %s20_s22 }
   0x3   :  { %s453_s24 = smov 8  }
   0x4   :  { %26 = dma.hbm_to_vmem [thread:$0]  %s19_s20, 12544, %s21_s22, [#allocation3], %s452_s23, %s452_s23, %s453_s24  }
   0x5   :  { %447 = dma.done.wait [#allocation3], 12544  }
   0x6   :  { %448 = vsyncadd [#allocation3], 4294954752  ;;  %v59_v0 = vld [vmem:[#allocation2 + $0x78] sm:$0xff]  ;;  %v58_v1 = vld [vmem:[#allocation2 + $0x70] sm:$0xff]  ;;  %vm142_vm0 = vcmask 130048   ;;  %vm336_vm1 = vcmask 523264  }
   0x7   :  { %v75_v2 = vld [vmem:[#allocation2 + $0xf8] sm:$0xff]  ;;  %146 = vmatpush.msra.mxu0 %v59_v0  ;;  %v74_v3 = vld [vmem:[#allocation2 + $0xf0] sm:$0xff]  ;;  %v57_v4 = vld [vmem:[#allocation2 + $0x68] sm:$0xff]  ;;  %s378_s11 = sshll.u32 %s592_s5, 4  ;;  %s379_s11 = int_to_ptr.hbm [resolvable:$true] %s378_s11 }
   0x8   :  { %166 = vmatpush.msra.mxu1 %v75_v2  ;;  %v73_v5 = vld [vmem:[#allocation2 + $0xe8] sm:$0xff]  ;;  %v56_v6 = vld [vmem:[#allocation2 + $0x60] sm:$0xff]  ;;  %v55_v8 = vld [vmem:[#allocation2 + $0x58] sm:$0xff] }
   0x9   :  { %147 = vmatpush.msra.mxu0 %v58_v1  ;;  %v72_v7 = vld [vmem:[#allocation2 + $0xe0] sm:$0xff]  ;;  %v71_v9 = vld [vmem:[#allocation2 + $0xd8] sm:$0xff]  ;;  %v90_v11 = vld [vmem:[#allocation2 + $0x170] sm:$0xff] }
   0xa   :  { %167 = vmatpush.msra.mxu1 %v74_v3  ;;  %v91_v10 = vld [vmem:[#allocation2 + $0x178] sm:$0xff]  ;;  %v54_v13 = vld [vmem:[#allocation2 + $0x50] sm:$0xff]  ;;  %v89_v15 = vld [vmem:[#allocation2 + $0x168] sm:$0xff] }
   0xb   :  { %148 = vmatpush.msra.mxu0 %v57_v4  ;;  %v107_v12 = vld [vmem:[#allocation2 + $0x1f8] sm:$0xff]  ;;  %v70_v14 = vld [vmem:[#allocation2 + $0xd0] sm:$0xff]  ;;  %186 = vmatpush.msra.mxu2 %v91_v10  ;;  %v53_v17 = vld [vmem:[#allocation2 + $0x48] sm:$0xff] }
   0xc   :  { %168 = vmatpush.msra.mxu1 %v73_v5  ;;  %206 = vmatpush.msra.mxu3 %v107_v12  ;;  %v106_v16 = vld [vmem:[#allocation2 + $0x1f0] sm:$0xff]  ;;  %v69_v18 = vld [vmem:[#allocation2 + $0xc8] sm:$0xff]  ;;  %v88_v20 = vld [vmem:[#allocation2 + $0x160] sm:$0xff] }
   0xd   :  { %149 = vmatpush.msra.mxu0 %v56_v6  ;;  %187 = vmatpush.msra.mxu2 %v90_v11  ;;  %v105_v19 = vld [vmem:[#allocation2 + $0x1e8] sm:$0xff]  ;;  %v104_v21 = vld [vmem:[#allocation2 + $0x1e0] sm:$0xff]  ;;  %v87_v24 = vld [vmem:[#allocation2 + $0x158] sm:$0xff] }
   0xe   :  { %169 = vmatpush.msra.mxu1 %v72_v7  ;;  %207 = vmatpush.msra.mxu3 %v106_v16  ;;  %v52_v22 = vld [vmem:[#allocation2 + $0x40] sm:$0xff]  ;;  %v103_v25 = vld [vmem:[#allocation2 + $0x1d8] sm:$0xff]  ;;  %v86_v28 = vld [vmem:[#allocation2 + $0x150] sm:$0xff] }
   0xf   :  { %150 = vmatpush.msra.mxu0 %v55_v8  ;;  %v68_v23 = vld [vmem:[#allocation2 + $0xc0] sm:$0xff]  ;;  %188 = vmatpush.msra.mxu2 %v89_v15  ;;  %v51_v26 = vld [vmem:[#allocation2 + $0x38] sm:$0xff]  ;;  %v102_v29 = vld [vmem:[#allocation2 + $0x1d0] sm:$0xff] }
  0x10   :  { %170 = vmatpush.msra.mxu1 %v71_v9  ;;  %208 = vmatpush.msra.mxu3 %v105_v19  ;;  %v67_v27 = vld [vmem:[#allocation2 + $0xb8] sm:$0xff]  ;;  %v50_v30 = vld [vmem:[#allocation2 + $0x30] sm:$0xff]  ;;  %v85_v32 = vld [vmem:[#allocation2 + $0x148] sm:$0xff] }
  0x11   :  { %151 = vmatpush.msra.mxu0 %v54_v13  ;;  %189 = vmatpush.msra.mxu2 %v88_v20  ;;  %v66_v31 = vld [vmem:[#allocation2 + $0xb0] sm:$0xff]  ;;  %v101_v33 = vld [vmem:[#allocation2 + $0x1c8] sm:$0xff]  ;;  %v84_v36 = vld [vmem:[#allocation2 + $0x140] sm:$0xff] }
  0x12   :  { %171 = vmatpush.msra.mxu1 %v70_v14  ;;  %209 = vmatpush.msra.mxu3 %v104_v21  ;;  %v49_v34 = vld [vmem:[#allocation2 + $0x28] sm:$0xff]  ;;  %v100_v37 = vld [vmem:[#allocation2 + $0x1c0] sm:$0xff]  ;;  %v83_v40 = vld [vmem:[#allocation2 + $0x138] sm:$0xff] }
  0x13   :  { %152 = vmatpush.msra.mxu0 %v53_v17  ;;  %190 = vmatpush.msra.mxu2 %v87_v24  ;;  %v65_v35 = vld [vmem:[#allocation2 + $0xa8] sm:$0xff]  ;;  %v48_v38 = vld [vmem:[#allocation2 + $0x20] sm:$0xff]  ;;  %v99_v41 = vld [vmem:[#allocation2 + $0x1b8] sm:$0xff] }
  0x14   :  { %172 = vmatpush.msra.mxu1 %v69_v18  ;;  %210 = vmatpush.msra.mxu3 %v103_v25  ;;  %v64_v39 = vld [vmem:[#allocation2 + $0xa0] sm:$0xff]  ;;  %v47_v42 = vld [vmem:[#allocation2 + $0x18] sm:$0xff]  ;;  %v82_v44 = vld [vmem:[#allocation2 + $0x130] sm:$0xff] }
  0x15   :  { %153 = vmatpush.msra.mxu0 %v52_v22  ;;  %191 = vmatpush.msra.mxu2 %v86_v28  ;;  %v63_v43 = vld [vmem:[#allocation2 + $0x98] sm:$0xff]  ;;  %v98_v45 = vld [vmem:[#allocation2 + $0x1b0] sm:$0xff]  ;;  %v81_v48 = vld [vmem:[#allocation2 + $0x128] sm:$0xff] }
  0x16   :  { %173 = vmatpush.msra.mxu1 %v68_v23  ;;  %211 = vmatpush.msra.mxu3 %v102_v29  ;;  %v46_v46 = vld [vmem:[#allocation2 + $0x10] sm:$0xff]  ;;  %v97_v49 = vld [vmem:[#allocation2 + $0x1a8] sm:$0xff]  ;;  %v80_v52 = vld [vmem:[#allocation2 + $0x120] sm:$0xff] }
  0x17   :  { %154 = vmatpush.msra.mxu0 %v51_v26  ;;  %192 = vmatpush.msra.mxu2 %v85_v32  ;;  %v62_v47 = vld [vmem:[#allocation2 + $0x90] sm:$0xff]  ;;  %v45_v50 = vld [vmem:[#allocation2 + $0x8] sm:$0xff]  ;;  %v96_v53 = vld [vmem:[#allocation2 + $0x1a0] sm:$0xff] }
  0x18   :  { %174 = vmatpush.msra.mxu1 %v67_v27  ;;  %212 = vmatpush.msra.mxu3 %v101_v33  ;;  %v61_v51 = vld [vmem:[#allocation2 + $0x88] sm:$0xff]  ;;  %v44_v54 = vld [vmem:[#allocation2] sm:$0xff]  ;;  %v123_v56 = vld [vmem:[#allocation2 + $0x278] sm:$0xff] }
  0x19   :  { %155 = vmatpush.msra.mxu0 %v50_v30  ;;  %193 = vmatpush.msra.mxu2 %v84_v36  ;;  %v60_v55 = vld [vmem:[#allocation2 + $0x80] sm:$0xff]  ;;  %v139_v57 = vld [vmem:[#allocation2 + $0x2f8] sm:$0xff]  ;;  %v122_v60 = vld [vmem:[#allocation2 + $0x270] sm:$0xff] }
  0x1a   :  { %175 = vmatpush.msra.mxu1 %v66_v31  ;;  %213 = vmatpush.msra.mxu3 %v100_v37  ;;  %v79_v58 = vld [vmem:[#allocation2 + $0x118] sm:$0xff]  ;;  %v138_v61 = vld [vmem:[#allocation2 + $0x2f0] sm:$0xff]  ;;  %v121_v0 = vld [vmem:[#allocation2 + $0x268] sm:$0xff] }
  0x1b   :  { %156 = vmatpush.msra.mxu0 %v49_v34  ;;  %194 = vmatpush.msra.mxu2 %v83_v40  ;;  %v95_v59 = vld [vmem:[#allocation2 + $0x198] sm:$0xff]  ;;  %v78_v62 = vld [vmem:[#allocation2 + $0x110] sm:$0xff]  ;;  %v137_v1 = vld [vmem:[#allocation2 + $0x2e8] sm:$0xff] }
  0x1c   :  { %176 = vmatpush.msra.mxu1 %v65_v35  ;;  %214 = vmatpush.msra.mxu3 %v99_v41  ;;  %v94_v63 = vld [vmem:[#allocation2 + $0x190] sm:$0xff]  ;;  %v77_v2 = vld [vmem:[#allocation2 + $0x108] sm:$0xff]  ;;  %v120_v4 = vld [vmem:[#allocation2 + $0x260] sm:$0xff] }
  0x1d   :  { %157 = vmatpush.msra.mxu0 %v48_v38  ;;  %195 = vmatpush.msra.mxu2 %v82_v44  ;;  %v93_v3 = vld [vmem:[#allocation2 + $0x188] sm:$0xff]  ;;  %v136_v5 = vld [vmem:[#allocation2 + $0x2e0] sm:$0xff]  ;;  %v119_v8 = vld [vmem:[#allocation2 + $0x258] sm:$0xff] }
  0x1e   :  { %177 = vmatpush.msra.mxu1 %v64_v39  ;;  %215 = vmatpush.msra.mxu3 %v98_v45  ;;  %v76_v6 = vld [vmem:[#allocation2 + $0x100] sm:$0xff]  ;;  %v135_v9 = vld [vmem:[#allocation2 + $0x2d8] sm:$0xff]  ;;  %v39_v10 = vld [vmem:[%s587_s0 + $0x10] sm:$0xff] }
  0x1f   :  { %158 = vmatpush.msra.mxu0 %v47_v42  ;;  %196 = vmatpush.msra.mxu2 %v81_v48  ;;  %v92_v7 = vld [vmem:[#allocation2 + $0x180] sm:$0xff]  ;;  %v40_v11 = vld [vmem:[%s587_s0 + $0x18] sm:$0xff]  ;;  %v118_v12 = vld [vmem:[#allocation2 + $0x250] sm:$0xff] }
  0x20   :  { %178 = vmatpush.msra.mxu1 %v63_v43  ;;  %216 = vmatpush.msra.mxu3 %v97_v49  ;;  %v134_v13 = vld [vmem:[#allocation2 + $0x2d0] sm:$0xff]  ;;  %v141_v14 = vld [vmem:[#allocation2 + $0x308] sm:$0xff]  ;;  %v37_v15 = vld [vmem:[%s587_s0] sm:$0xff] }
  0x21   :  { %159 = vmatpush.msra.mxu0 %v46_v46  ;;  %197 = vmatpush.msra.mxu2 %v80_v52  ;;  %v117_v16 = vld [vmem:[#allocation2 + $0x248] sm:$0xff]  ;;  %v140_v19 = vld [vmem:[#allocation2 + $0x300] sm:$0xff]  ;;  %v302_v22 = vld [vmem:[%s589_s2 + $0x78] sm:$0xff] }
  0x22   :  { %179 = vmatpush.msra.mxu1 %v62_v47  ;;  %217 = vmatpush.msra.mxu3 %v96_v53  ;;  %v133_v17 = vld [vmem:[#allocation2 + $0x2c8] sm:$0xff]  ;;  %v116_v20 = vld [vmem:[#allocation2 + $0x240] sm:$0xff]  ;;  %v115_v23 = vld [vmem:[#allocation2 + $0x238] sm:$0xff] }
  0x23   :  { %160 = vmatpush.msra.mxu0 %v45_v50  ;;  %198 = vmatpush.msra.mxu2 %v79_v58  ;;  %v38_v18 = vld [vmem:[%s587_s0 + $0x8] sm:$0xff]  ;;  %v132_v21 = vld [vmem:[#allocation2 + $0x2c0] sm:$0xff]  ;;  %v131_v24 = vld [vmem:[#allocation2 + $0x2b8] sm:$0xff] }
  0x24   :  { %180 = vmatpush.msra.mxu1 %v61_v51  ;;  %218 = vmatpush.msra.mxu3 %v95_v59  ;;  %v43_v25 = vld [vmem:[%s587_s0 + $0x30] sm:$0xff]  ;;  %v300_v29 = vld [vmem:[%s589_s2 + $0x68] sm:$0xff]  ;;  %v299_v32 = vld [vmem:[%s589_s2 + $0x60] sm:$0xff] }
  0x25   :  { %161 = vmatpush.msra.mxu0 %v44_v54  ;;  %199 = vmatpush.msra.mxu2 %v78_v62  ;;  %v301_v26 = vld [vmem:[%s589_s2 + $0x70] sm:$0xff]  ;;  %v113_v30 = vld [vmem:[#allocation2 + $0x228] sm:$0xff]  ;;  %v112_v33 = vld [vmem:[#allocation2 + $0x220] sm:$0xff] }
  0x26   :  { %181 = vmatpush.msra.mxu1 %v60_v55  ;;  %219 = vmatpush.msra.mxu3 %v94_v63  ;;  %v114_v27 = vld [vmem:[#allocation2 + $0x230] sm:$0xff]  ;;  %v129_v31 = vld [vmem:[#allocation2 + $0x2a8] sm:$0xff]  ;;  %v128_v34 = vld [vmem:[#allocation2 + $0x2a0] sm:$0xff] }
  0x27   :  { %226 = vmatpush.msrb.mxu0 %v123_v56  ;;  %200 = vmatpush.msra.mxu2 %v77_v2  ;;  %v130_v28 = vld [vmem:[#allocation2 + $0x2b0] sm:$0xff]  ;;  %v298_v35 = vld [vmem:[%s589_s2 + $0x58] sm:$0xff]  ;;  %v296_v41 = vld [vmem:[%s589_s2 + $0x48] sm:$0xff] }
  0x28   :  { %246 = vmatpush.msrb.mxu1 %v139_v57  ;;  %220 = vmatpush.msra.mxu3 %v93_v3  ;;  %v111_v36 = vld [vmem:[#allocation2 + $0x218] sm:$0xff]  ;;  %v297_v38 = vld [vmem:[%s589_s2 + $0x50] sm:$0xff]  ;;  %v109_v42 = vld [vmem:[#allocation2 + $0x208] sm:$0xff] }
  0x29   :  { %227 = vmatpush.msrb.mxu0 %v122_v60  ;;  %201 = vmatpush.msra.mxu2 %v76_v6  ;;  %v127_v37 = vld [vmem:[#allocation2 + $0x298] sm:$0xff]  ;;  %v110_v39 = vld [vmem:[#allocation2 + $0x210] sm:$0xff]  ;;  %v125_v43 = vld [vmem:[#allocation2 + $0x288] sm:$0xff] }
  0x2a   :  { %247 = vmatpush.msrb.mxu1 %v138_v61  ;;  %221 = vmatpush.msra.mxu3 %v92_v7  ;;  %v126_v40 = vld [vmem:[#allocation2 + $0x290] sm:$0xff]  ;;  %v108_v44 = vld [vmem:[#allocation2 + $0x200] sm:$0xff]  ;;  %v42_v47 = vld [vmem:[%s587_s0 + $0x28] sm:$0xff] }
  0x2b   :  { %228 = vmatpush.msrb.mxu0 %v121_v0  ;;  %202 = vmatmul.f32.vlgmr.msra.gmra.mxu2 %v39_v10  ;;  %v124_v45 = vld [vmem:[#allocation2 + $0x280] sm:$0xff]  ;;  %v294_v49 = vld [vmem:[%s589_s2 + $0x38] sm:$0xff]  ;;  %v293_v50 = vld [vmem:[%s589_s2 + $0x30] sm:$0xff] }
  0x2c   :  { %248 = vmatpush.msrb.mxu1 %v137_v1  ;;  %222 = vmatmul.f32.vlgmr.msra.gmra.mxu3 %v40_v11  ;;  %v41_v46 = vld [vmem:[%s587_s0 + $0x20] sm:$0xff]  ;;  %v292_v51 = vld [vmem:[%s589_s2 + $0x28] sm:$0xff]  ;;  %v290_v53 = vld [vmem:[%s589_s2 + $0x18] sm:$0xff] }
  0x2d   :  { %229 = vmatpush.msrb.mxu0 %v120_v4  ;;  %280 = vmatpush.msrb.mxu2 %v141_v14  ;;  %v295_v48 = vld [vmem:[%s589_s2 + $0x40] sm:$0xff]  ;;  %v289_v54 = vld [vmem:[%s589_s2 + $0x10] sm:$0xff]  ;;  %v288_v55 = vld [vmem:[%s589_s2 + $0x8] sm:$0xff] }
  0x2e   :  { %249 = vmatpush.msrb.mxu1 %v136_v5  ;;  %162 = vmatmul.f32.vlgmr.msra.gmra.mxu0 %v37_v15  ;;  %v291_v52 = vld [vmem:[%s589_s2 + $0x20] sm:$0xff]  ;;  %v331_v57 = vld [vmem:[%s590_s3 + $0x38] sm:$0xff]  ;;  %v330_v58 = vld [vmem:[%s590_s3 + $0x30] sm:$0xff] }
  0x2f   :  { %230 = vmatpush.msrb.mxu0 %v119_v8  ;;  %182 = vmatmul.f32.vlgmr.msra.gmra.mxu1 %v38_v18  ;;  %v287_v56 = vld [vmem:[%s589_s2] sm:$0xff]  ;;  %v329_v59 = vld [vmem:[%s590_s3 + $0x28] sm:$0xff]  ;;  %v327_v61 = vld [vmem:[%s590_s3 + $0x18] sm:$0xff] }
  0x30   :  { %250 = vmatpush.msrb.mxu1 %v135_v9  ;;  %281 = vmatpush.msrb.mxu2 %v140_v19  ;;  %v328_v60 = vld [vmem:[%s590_s3 + $0x20] sm:$0xff]  ;;  %v326_v62 = vld [vmem:[%s590_s3 + $0x10] sm:$0xff] }
  0x31   :  { %231 = vmatpush.msrb.mxu0 %v118_v12  ;;  %303 = vmatpush.msrb.mxu3 %v302_v22  ;;  %v324_v14 = vld [vmem:[%s590_s3] sm:$0xff] }
  0x32   :  { %251 = vmatpush.msrb.mxu1 %v134_v13  ;;  %348 = vmatpush.msra.mxu2 %v331_v57  ;;  %v325_v13 = vld [vmem:[%s590_s3 + $0x8] sm:$0xff]  ;;  %s454_s3 = smov [#allocation5]  }
  0x33   :  { %232 = vmatpush.msrb.mxu0 %v117_v16  ;;  %388 = vmatmul.msk.f32.vlgmr.msrb.gmra.mxu2 %vm142_vm0, %v43_v25  ;;  %s376_s8 = sshll.u32 %s454_s3, 4  ;;  %s377_s8 = int_to_ptr.vmem [resolvable:$true] %s376_s8 }
  0x34   :  { %252 = vmatpush.msrb.mxu1 %v133_v17  ;;  %304 = vmatpush.msrb.mxu3 %v301_v26  ;;  %v394_v17 = vld [vmem:[%s591_s4] ss:$0 sm:$0xff] }
  0x35   :  { %233 = vmatpush.msrb.mxu0 %v116_v20  ;;  %349 = vmatpush.msra.mxu2 %v330_v58 }
  0x36   :  { %253 = vmatpush.msrb.mxu1 %v132_v21  ;;  %305 = vmatpush.msrb.mxu3 %v300_v29 }
  0x37   :  { %234 = vmatpush.msrb.mxu0 %v115_v23  ;;  %350 = vmatpush.msra.mxu2 %v329_v59 }
  0x38   :  { %254 = vmatpush.msrb.mxu1 %v131_v24  ;;  %306 = vmatpush.msrb.mxu3 %v299_v32 }
  0x39   :  { %235 = vmatpush.msrb.mxu0 %v114_v27  ;;  %351 = vmatpush.msra.mxu2 %v328_v60 }
  0x3a   :  { %255 = vmatpush.msrb.mxu1 %v130_v28  ;;  %307 = vmatpush.msrb.mxu3 %v298_v35 }
  0x3b   :  { %236 = vmatpush.msrb.mxu0 %v113_v30  ;;  %352 = vmatpush.msra.mxu2 %v327_v61 }
  0x3c   :  { %256 = vmatpush.msrb.mxu1 %v129_v31  ;;  %308 = vmatpush.msrb.mxu3 %v297_v38 }
  0x3d   :  { %237 = vmatpush.msrb.mxu0 %v112_v33  ;;  %353 = vmatpush.msra.mxu2 %v326_v62 }
  0x3e   :  { %257 = vmatpush.msrb.mxu1 %v128_v34  ;;  %309 = vmatpush.msrb.mxu3 %v296_v41 }
  0x3f   :  { %238 = vmatpush.msrb.mxu0 %v111_v36  ;;  %354 = vmatpush.msra.mxu2 %v325_v13 }
  0x40   :  { %258 = vmatpush.msrb.mxu1 %v127_v37  ;;  %310 = vmatpush.msrb.mxu3 %v295_v48 }
  0x41   :  { %239 = vmatpush.msrb.mxu0 %v110_v39  ;;  %355 = vmatpush.msra.mxu2 %v324_v14 }
  0x42   :  { %259 = vmatpush.msrb.mxu1 %v126_v40  ;;  %311 = vmatpush.msrb.mxu3 %v294_v49 }
  0x43   :  { %240 = vmatpush.msrb.mxu0 %v109_v42 }
  0x44   :  { %260 = vmatpush.msrb.mxu1 %v125_v43  ;;  %312 = vmatpush.msrb.mxu3 %v293_v50 }
  0x45   :  { %241 = vmatpush.msrb.mxu0 %v108_v44 }
  0x46   :  { %261 = vmatpush.msrb.mxu1 %v124_v45  ;;  %242 = vmatmul.f32.vlgmr.msrb.gmra.mxu0 %v41_v46 }
  0x47   :  { %262 = vmatmul.f32.vlgmr.msrb.gmra.mxu1 %v42_v47  ;;  %313 = vmatpush.msrb.mxu3 %v292_v51 }
  0x49   :  { %314 = vmatpush.msrb.mxu3 %v291_v52 }
  0x4b   :  { %315 = vmatpush.msrb.mxu3 %v290_v53 }
  0x4d   :  { %316 = vmatpush.msrb.mxu3 %v289_v54 }
  0x4f   :  { %317 = vmatpush.msrb.mxu3 %v288_v55 }
  0x51   :  { %318 = vmatpush.msrb.mxu3 %v287_v56 }
  0xab   :  { %v163_v63 = vpop.f32.mrf.mxu0 }
  0xac   :  { %v183_v0 = vpop.f32.mrf.mxu1 }
  0xad   :  { %v184_v1 = vadd.f32 %v183_v0, %v163_v63 }
  0xae   :  { %v203_v2 = vpop.f32.mrf.mxu2 }
  0xaf   :  { %v204_v3 = vadd.f32 %v203_v2, %v184_v1  ;;  %v223_v4 = vpop.f32.mrf.mxu3 }
  0xb1   :  { %v224_v5 = vadd.f32 %v223_v4, %v204_v3 }
  0xb6   :  { %v283_v9 = vpop.f32.mrf.mxu2 }
  0xc3   :  { %v243_v6 = vpop.f32.mrf.mxu0 }
  0xc4   :  { %v263_v7 = vpop.f32.mrf.mxu1  ;;  %v244_v8 = vadd.f32 %v243_v6, %v224_v5 }
  0xc6   :  { %v264_v10 = vadd.f32 %v263_v7, %v244_v8 }
  0xc8   :  { %v284_v11 = vadd.f32 %v283_v9, %v264_v10 }
  0xca   :  { %v286_v12 = vmax.f32 %v284_v11, 0.0 }
  0xcc   :  { %319 = vmatmul.f32.vlgmr.msrb.gmra.mxu3 %v286_v12 }
 0x14f   :  { %v320_v15 = vpop.f32.mrf.mxu3 }
 0x150   :  { %v323_v16 = vmax.f32 %v320_v15, 0.0 }
 0x152   :  { %389 = vmatmul.msk.f32.vlgmr.msra.gmra.mxu2 %vm336_vm1, %v323_v16 }
 0x1d5   :  { %v357_v18 = vpop.f32.mrf.mxu2 }
 0x1d6   :  { %v358_v19 = vadd.f32 %v394_v17, %v357_v18 }
 0x1d8   :  { %360 = vmax.xlane.f32.xlu0 %v358_v19 }
 0x24b   :  { %v361_v20 = vpop.xlane.xlu0 %360 }
 0x24c   :  { %v362_v21 = vsub.f32 %v358_v19, %v361_v20 }
 0x24e   :  { %v363_v22 = vmul.f32 1.442695, %v362_v21 }
 0x250   :  { %395 = vpow2.f32 %v363_v22 }
 0x256   :  { %v396_v23 = vpop.eup %395 }
 0x257   :  { %365 = vadd.xlane.f32.xlu0 %v396_v23 }
 0x2ca   :  { %v366_v24 = vpop.xlane.xlu0 %365 }
 0x2cb   :  { %397 = vlog2.f32 %v366_v24 }
 0x2d1   :  { %v398_v25 = vpop.eup %397 }
 0x2d2   :  { %v368_v26 = vmul.f32 0.6931472, %v398_v25 }
 0x2d4   :  { %v369_v27 = vsub.f32 %v362_v21, %v368_v26 }
 0x2d6   :  { %370 = vst [vmem:[#allocation5] sm:$0xff] %v369_v27 }
 0x2d7   :  { %381 = dma.vmem_to_hbm [thread:$0]  %s377_s8, 128, %s379_s11, [#allocation4]  }
 0x2d8   :  { %449 = dma.done.wait [#allocation4], 128  }
 0x2d9   :  { %450 = vsyncadd [#allocation4], 4294967168 }
 0x2da   :  { %386 = vsyncpa [#allocation3], 1 }
 0x2db   :  { %387 = vsyncpa [#allocation4], 1 }

</bundles_post_ra>
